<compile_context>
chip_gen: v5e
topology: v5e:2x2
jax: 0.10.0
libtpu: 0.0.40
codegen_flags: <defaults>
</compile_context>

<pallas_src>
import functools

import jax
import jax.numpy as jnp
from jax.experimental import pallas as pl
from jax.experimental.pallas import tpu as pltpu

N_DIMS = 3          # spatial dimensionality, matches n_dims=3 default in the module
NEG_INF = -1e9      # masked-edge sentinel folded into the combined bias (bf16-safe)


def _round_up(x, m):
    return (x + m - 1) // m * m


def _pipeline_mode_supported():
    """Static capability check for single-buffered (grid-invariant) weight blocks."""
    if not hasattr(pl, "Buffered"):
        return False
    try:
        pl.BlockSpec((8, 128), lambda i: (0, 0), pipeline_mode=pl.Buffered(1))
        return True
    except Exception:
        return False


_SINGLE_BUFFER_WEIGHTS = _pipeline_mode_supported()


# --------------------------------------------------------------------------- #
# Kernel
# --------------------------------------------------------------------------- #
def _transformer_block_kernel(h_ref, node_mask_ref, bias_ref,
                              w_emb_ref, b_emb_ref, wq_ref, wk_ref, wv_ref,
                              wo_ref, w1_ref, w2_ref, wh_out_ref, wx_ref,
                              out_ref):
    f32 = jnp.float32
    bf16 = jnp.bfloat16

    bb, n, _ = bias_ref.shape
    h_dims = h_ref.shape[-1]
    hidden = wq_ref.shape[0]
    out_pad = out_ref.shape[-1]

    node_mask = node_mask_ref[...].astype(f32)                 # (BB, N, 1)
    h2d = h_ref[...]                                           # bf16 (BB*N, F), pre-flattened

    # ---- node-feature embedding (flattened rows -> one MXU matmul) ----
    h0 = jnp.dot(h2d, w_emb_ref[...], preferred_element_type=f32) + b_emb_ref[...]
    h0_b = h0.astype(bf16)

    # ---- biased, masked single-head attention ----
    # wq already carries the 1/sqrt(hidden) scale (folded at weight-prep time).
    q = jnp.dot(h0_b, wq_ref[...], preferred_element_type=f32)
    k = jnp.dot(h0_b, wk_ref[...], preferred_element_type=f32)
    v = jnp.dot(h0_b, wv_ref[...], preferred_element_type=f32)
    q3 = q.astype(bf16).reshape(bb, n, hidden)
    k3 = k.astype(bf16).reshape(bb, n, hidden)
    v3 = v.astype(bf16).reshape(bb, n, hidden)

    bias = bias_ref[...].astype(f32)                           # bf16 stream -> f32, -1e9 where masked
    valid = (bias > -1e8).astype(f32)                          # per-edge validity indicator
    scores = jnp.einsum('bqd,bkd->bqk', q3, k3,
                        preferred_element_type=f32) + bias
    m = jnp.max(scores, axis=-1, keepdims=True)
    p = jnp.exp(scores - m) * valid                            # masked cols -> 0; fully-masked rows -> 0
    denom = jnp.sum(p, axis=-1, keepdims=True)
    attn = p * pl.reciprocal(denom + 1e-9, approx=True)        # safe even if denom == 0
    ao = jnp.einsum('bqk,bkd->bqd', attn.astype(bf16), v3,
                    preferred_element_type=f32)                # (BB, N, H)

    h1 = h0 + jnp.dot(ao.reshape(bb * n, hidden).astype(bf16), wo_ref[...],
                      preferred_element_type=f32)
    h1_b = h1.astype(bf16)

    # ---- feed-forward block ----
    ff = jnp.maximum(jnp.dot(h1_b, w1_ref[...], preferred_element_type=f32), 0.0)
    h2 = h1 + jnp.dot(ff.astype(bf16), w2_ref[...], preferred_element_type=f32)
    h2_b = h2.astype(bf16)

    # ---- output heads ----
    h_final = jnp.dot(h2_b, wh_out_ref[...],
                      preferred_element_type=f32).reshape(bb, n, h_dims)
    h_final = h_final * node_mask                              # zero out padded nodes
    dx = jnp.tanh(jnp.dot(h2_b, wx_ref[...],
                          preferred_element_type=f32)).reshape(bb, n, N_DIMS)

    # ---- velocity + remove_mean_with_mask  (x cancels: vel = dx * node_mask) ----
    vel = dx * node_mask
    n_valid = jnp.maximum(jnp.sum(node_mask, axis=1, keepdims=True), 1.0)   # (BB, 1, 1)
    mean = jnp.sum(vel, axis=1, keepdims=True) / n_valid
    vel = (vel - mean) * node_mask

    # ---- single combined output slab: [vel | h_final | zero pad] ----
    pieces = [vel, h_final]
    pad = out_pad - (N_DIMS + h_dims)
    if pad > 0:
        pieces.append(jnp.zeros((bb, n, pad), f32))
    out_ref[...] = jnp.concatenate(pieces, axis=-1).astype(out_ref.dtype)


# --------------------------------------------------------------------------- #
# Glue (adjacency, spatial bias, parameter setup, block / VMEM sizing)
# --------------------------------------------------------------------------- #
def init_params(key, h_dims, hidden, num_spatial):
    # NOTE: with hidden=32 the MXU contraction is under-filled (32 of 128/256 rows);
    # if model dims are tunable, hidden should be padded to a multiple of 128.
    ks = jax.random.split(key, 11)
    s = 0.1
    return {
        "w_emb":  jax.random.normal(ks[0], (h_dims, hidden), jnp.float32) * s,
        "b_emb":  jax.random.normal(ks[1], (1, hidden), jnp.float32) * s,
        "wq":     jax.random.normal(ks[2], (hidden, hidden), jnp.float32) * s,
        "wk":     jax.random.normal(ks[3], (hidden, hidden), jnp.float32) * s,
        "wv":     jax.random.normal(ks[4], (hidden, hidden), jnp.float32) * s,
        "wo":     jax.random.normal(ks[5], (hidden, hidden), jnp.float32) * s,
        "w1":     jax.random.normal(ks[6], (hidden, 4 * hidden), jnp.float32) * s,
        "w2":     jax.random.normal(ks[7], (4 * hidden, hidden), jnp.float32) * s,
        "wh_out": jax.random.normal(ks[8], (hidden, h_dims), jnp.float32) * s,
        "wx":     jax.random.normal(ks[9], (hidden, N_DIMS), jnp.float32) * s,
        "spatial_emb": jax.random.normal(ks[10], (num_spatial,), jnp.float32) * s,
    }


def _adj_and_bias(params, edges, attn_bias, edge_mask, num_spatial):
    """adj from one-hot edge types; combined (attn + spatial + mask) score bias in bf16."""
    adj = jnp.sum(edges[:, :, :, 1:], axis=-1).astype(jnp.int32)          # (bs, N, N)
    # TODO(synk): diffusion_utils.get_spatial_positions is external to the module;
    # approximated as the (masked, clipped) adjacency count indexing a learned table.
    spatial_pos = jnp.clip(adj, 0, num_spatial - 1) * (edge_mask > 0).astype(jnp.int32)
    spatial_bias = params["spatial_emb"][spatial_pos]                     # (bs, N, N)
    bias = jnp.where(edge_mask > 0,
                     attn_bias.astype(jnp.float32) + spatial_bias,
                     jnp.float32(NEG_INF))
    # bf16 halves the only O(N^2) per-step input stream; -1e9 rounds to ~-9.98e8,
    # still far below the -1e8 validity threshold used inside the kernel.
    return adj, bias.astype(jnp.bfloat16)


def _weight_list(params):
    bf16 = jnp.bfloat16
    hidden = params["wq"].shape[0]
    scale = 1.0 / (hidden ** 0.5)
    return [
        params["w_emb"].astype(bf16),
        params["b_emb"].astype(jnp.float32),           # added post-matmul in f32
        (params["wq"] * scale).astype(bf16),           # 1/sqrt(hidden) folded into wq
        params["wk"].astype(bf16),
        params["wv"].astype(bf16),
        params["wo"].astype(bf16),
        params["w1"].astype(bf16),
        params["w2"].astype(bf16),
        params["wh_out"].astype(bf16),
        params["wx"].astype(bf16),
    ]


def _tpu_caps():
    """Trace-time hardware query with conservative fallbacks."""
    vmem_bytes = 128 * 1024 * 1024
    num_tc = 1
    try:
        info = pltpu.get_tpu_info()
        vmem_bytes = int(getattr(info, "vmem_capacity_bytes", vmem_bytes))
        num_tc = int(getattr(info, "num_cores", 1) or 1)
    except Exception:
        pass
    if vmem_bytes <= 64 * 1024 * 1024:
        # 64 MiB VMEM per TensorCore => v7x-class chip with 2 TCs: keep >= 2 grid
        # steps so the "parallel" batch axis can be sharded across both cores.
        num_tc = max(num_tc, 2)
    return vmem_bytes, num_tc


def _pick_block_bs(bs, n_nodes, h_dims, hidden, out_pad, weight_bytes,
                   vmem_limit_bytes, target_rows, max_bb):
    """Largest divisor BB of bs such that:
      * BB <= max_bb (>= 2 grid steps on v7x so both TensorCores get work),
      * BB*n_nodes is a multiple of 8 (or the full extent) for the flattened h block,
      * per-step VMEM (double-buffered I/O blocks + f32 activation temporaries +
        weights charged at 2x) fits inside ~70% of the scoped VMEM limit,
      * BB*n_nodes does not far exceed target_rows (MXU M-dimension fill)."""
    budget = int(0.7 * vmem_limit_bytes)
    best = None
    for bb in range(1, max(1, min(bs, max_bb)) + 1):
        if bs % bb:
            continue
        rows = bb * n_nodes
        if rows % 8 and rows != bs * n_nodes:
            continue
        io_bytes = 2 * (rows * h_dims * 2                       # h block (bf16)
                        + bb * n_nodes * 4                      # node_mask block (f32)
                        + bb * n_nodes * n_nodes * 2            # bias block (bf16)
                        + bb * n_nodes * out_pad * 4)           # combined output block (f32)
        act_bytes = rows * 4 * (3 * n_nodes                     # scores / p / attn (f32)
                                + 12 * hidden                   # h0..h2, q/k/v (+bf16 copies), ao
                                + 4 * hidden                    # ffn hidden
                                + h_dims + out_pad)             # heads + combined slab
        total = io_bytes + act_bytes + 2 * weight_bytes
        if total > budget:
            continue
        if rows <= max(target_rows, n_nodes):
            best = bb
    if best is None:
        best = 1 if (n_nodes % 8 == 0 or bs == 1) else bs       # full-extent fallback
    return best


@functools.partial(jax.jit,
                   static_argnames=("num_spatial", "block_bs",
                                    "single_buffer_weights", "out_lane_pad"))
def transformer_dynamics_forward(params, t, xh, edges, attn_bias, node_mask,
                                 edge_mask, num_spatial=9, block_bs=None,
                                 single_buffer_weights=None, out_lane_pad=None):
    """Mirrors Transformer_dynamics._forward (condition_time=False, context=None, use3d=True)."""
    del t  # condition_time=False -> t is not used
    f32, bf16 = jnp.float32, jnp.bfloat16
    bs, n_nodes, dims = xh.shape
    h_dims = dims - N_DIMS
    assert h_dims > 0  # TODO(synk): h_dims == 0 path (h = ones) not implemented
    hidden = params["wq"].shape[0]
    out_dims = N_DIMS + h_dims

    if single_buffer_weights is None:
        single_buffer_weights = _SINGLE_BUFFER_WEIGHTS

    # Combined output slab width.  Pass out_lane_pad=128 for a fully lane-dense
    # (unmasked-vst) output at the cost of extra HBM write volume; default packs
    # to a multiple of 8, which is the better trade at narrow (h_dims+3) widths.
    out_pad = out_lane_pad if out_lane_pad is not None else _round_up(out_dims, 8)
    assert out_pad >= out_dims

    adj, bias = _adj_and_bias(params, edges, attn_bias, edge_mask, num_spatial)

    node_mask_f = node_mask.astype(f32).reshape(bs, n_nodes, 1)
    # xh = xh * node_mask ; h = xh[:, :, 3:].  x itself never enters the kernel:
    # it cancels algebraically in vel = (x_final - x) * node_mask.
    # Flattened in the wrapper so the kernel never merges a sublane-tiled dim.
    h_in = (xh[:, :, N_DIMS:].astype(f32) * node_mask_f
            ).astype(bf16).reshape(bs * n_nodes, h_dims)

    weights = _weight_list(params)
    weight_bytes = sum(int(w.size) * w.dtype.itemsize for w in weights)

    vmem_bytes, num_tc = _tpu_caps()
    vmem_limit = max(32 * 1024 * 1024,
                     min(int(vmem_bytes * 3 // 4), 100 * 1024 * 1024))

    if block_bs is None:
        max_bb = bs if num_tc <= 1 else max(1, bs // num_tc)
        block_bs = _pick_block_bs(bs, n_nodes, h_dims, hidden, out_pad,
                                  weight_bytes, vmem_limit,
                                  target_rows=512, max_bb=max_bb)
    assert bs % block_bs == 0, "block_bs must divide the batch size"

    def weight_spec(w):
        nd = w.ndim
        idx = lambda b, _nd=nd: (0,) * _nd
        if single_buffer_weights:
            # grid-invariant blocks: a second buffer buys nothing, only VMEM
            return pl.BlockSpec(w.shape, idx, pipeline_mode=pl.Buffered(1))
        return pl.BlockSpec(w.shape, idx)

    in_specs = ([pl.BlockSpec((block_bs * n_nodes, h_dims), lambda b: (b, 0)),     # h (bf16, flat)
                 pl.BlockSpec((block_bs, n_nodes, 1), lambda b: (b, 0, 0)),        # node_mask
                 pl.BlockSpec((block_bs, n_nodes, n_nodes), lambda b: (b, 0, 0))]  # bias (bf16)
                + [weight_spec(w) for w in weights])

    out_specs = pl.BlockSpec((block_bs, n_nodes, out_pad), lambda b: (b, 0, 0))
    out_shape = jax.ShapeDtypeStruct((bs, n_nodes, out_pad), f32)

    combined = pl.pallas_call(
        _transformer_block_kernel,
        out_shape=out_shape,
        grid=(bs // block_bs,),
        in_specs=in_specs,
        out_specs=out_specs,
        compiler_params=pltpu.CompilerParams(
            dimension_semantics=("parallel",),
            vmem_limit_bytes=vmem_limit),
    )(h_in, node_mask_f, bias, *weights)

    # single slab -> no wrapper concatenate; slice only if padding was requested
    out = combined if out_pad == out_dims else combined[:, :, :out_dims]
    adj_final = adj  # stand-in model passes the adjacency through unchanged
    return out, adj_final


# --------------------------------------------------------------------------- #
# Pure-JAX reference (same math, same bf16 operand casts) for correctness check
# --------------------------------------------------------------------------- #
def reference_forward(params, t, xh, edges, attn_bias, node_mask, edge_mask,
                      num_spatial=9):
    del t
    f32, bf16 = jnp.float32, jnp.bfloat16
    bs, n, dims = xh.shape
    h_dims = dims - N_DIMS
    _, bias_bf16 = _adj_and_bias(params, edges, attn_bias, edge_mask, num_spatial)
    bias = bias_bf16.astype(f32)
    node_mask = node_mask.astype(f32)
    h = (xh[:, :, N_DIMS:].astype(f32) * node_mask).astype(bf16).reshape(bs * n, h_dims)

    (w_emb, b_emb, wq, wk, wv, wo, w1, w2, wh_out, wx) = _weight_list(params)
    hidden = wq.shape[0]

    def mm(a, w):
        return jnp.dot(a.astype(bf16), w, preferred_element_type=f32)

    h0 = mm(h, w_emb) + b_emb
    q = mm(h0, wq).astype(bf16).reshape(bs, n, hidden)      # scale already folded into wq
    k = mm(h0, wk).astype(bf16).reshape(bs, n, hidden)
    v = mm(h0, wv).astype(bf16).reshape(bs, n, hidden)
    scores = jnp.einsum('bqd,bkd->bqk', q, k, preferred_element_type=f32) + bias
    valid = (bias > -1e8).astype(f32)
    p = jnp.exp(scores - jnp.max(scores, axis=-1, keepdims=True)) * valid
    attn = p / (jnp.sum(p, axis=-1, keepdims=True) + 1e-9)
    ao = jnp.einsum('bqk,bkd->bqd', attn.astype(bf16), v, preferred_element_type=f32)
    h1 = h0 + mm(ao.reshape(bs * n, hidden), wo)
    ff = jnp.maximum(mm(h1, w1), 0.0)
    h2 = h1 + mm(ff, w2)
    h_final = mm(h2, wh_out).reshape(bs, n, h_dims) * node_mask
    dx = jnp.tanh(mm(h2, wx)).reshape(bs, n, N_DIMS)
    vel = dx * node_mask
    nv = jnp.maximum(jnp.sum(node_mask, axis=1, keepdims=True), 1.0)
    vel = (vel - jnp.sum(vel, axis=1, keepdims=True) / nv) * node_mask
    return jnp.concatenate([vel, h_final], axis=-1)


# --------------------------------------------------------------------------- #
# Demo / self-test
# --------------------------------------------------------------------------- #
if __name__ == "__main__":
    key = jax.random.PRNGKey(0)
    bs, n_nodes = 2, 8
    h_dims, hidden = 5, 32
    dims = N_DIMS + h_dims
    n_edge_types = 4
    num_spatial = 9

    k_xh, k_edge, k_bias, k_params = jax.random.split(key, 4)

    xh = jax.random.normal(k_xh, (bs, n_nodes, dims), jnp.float32)

    edge_ids = jax.random.randint(k_edge, (bs, n_nodes, n_nodes), 0, n_edge_types)
    edges = jax.nn.one_hot(edge_ids, n_edge_types, dtype=jnp.float32)

    attn_bias = 0.1 * jax.random.normal(k_bias, (bs, n_nodes, n_nodes), jnp.float32)

    lengths = jnp.array([n_nodes, n_nodes - 2], dtype=jnp.int32)
    node_mask = (jnp.arange(n_nodes)[None, :] < lengths[:, None]).astype(jnp.float32)
    node_mask = node_mask[:, :, None]                                      # (bs, N, 1)
    eye = jnp.eye(n_nodes, dtype=jnp.float32)[None]
    edge_mask = node_mask * jnp.swapaxes(node_mask, 1, 2) * (1.0 - eye)    # (bs, N, N)

    t = jnp.array(0.5, dtype=jnp.float32)

    params = init_params(k_params, h_dims, hidden, num_spatial)

    out, adj_final = transformer_dynamics_forward(
        params, t, xh, edges, attn_bias, node_mask, edge_mask,
        num_spatial=num_spatial)
    out = jax.block_until_ready(out)
    adj_final = jax.block_until_ready(adj_final)

    ref = jax.block_until_ready(
        reference_forward(params, t, xh, edges, attn_bias, node_mask, edge_mask,
                          num_spatial=num_spatial))

    assert out.shape == (bs, n_nodes, dims)
    assert adj_final.shape == (bs, n_nodes, n_nodes)
    assert not bool(jnp.any(jnp.isnan(out)))

    vel = out[:, :, :N_DIMS]
    h_out = out[:, :, N_DIMS:]
    inv_mask = 1.0 - node_mask
    # padded nodes emit exactly zero (both velocity and features)
    assert float(jnp.max(jnp.abs(vel * inv_mask))) == 0.0
    assert float(jnp.max(jnp.abs(h_out * inv_mask))) == 0.0
    # masked mean of the velocity has been removed
    assert float(jnp.max(jnp.abs(jnp.sum(vel, axis=1)))) < 1e-4
    # matches the pure-JAX reference
    assert bool(jnp.allclose(out, ref, atol=1e-2, rtol=1e-2))

    print("KERNEL_OK")
</pallas_src>

<mosaic_0001>
module attributes {stable_mosaic.version = 11 : i64} {
  func.func @_transformer_block_kernel(%arg0: i32, %arg1: memref<16x5xbf16, #tpu.memory_space<vmem>>, %arg2: memref<2x8x1xf32, #tpu.memory_space<vmem>>, %arg3: memref<2x8x8xbf16, #tpu.memory_space<vmem>>, %arg4: memref<5x32xbf16, #tpu.memory_space<vmem>>, %arg5: memref<1x32xf32, #tpu.memory_space<vmem>>, %arg6: memref<32x32xbf16, #tpu.memory_space<vmem>>, %arg7: memref<32x32xbf16, #tpu.memory_space<vmem>>, %arg8: memref<32x32xbf16, #tpu.memory_space<vmem>>, %arg9: memref<32x32xbf16, #tpu.memory_space<vmem>>, %arg10: memref<32x128xbf16, #tpu.memory_space<vmem>>, %arg11: memref<128x32xbf16, #tpu.memory_space<vmem>>, %arg12: memref<32x5xbf16, #tpu.memory_space<vmem>>, %arg13: memref<32x3xbf16, #tpu.memory_space<vmem>>, %arg14: memref<2x8x8xf32, #tpu.memory_space<vmem>>) attributes {dimension_semantics = [#tpu.dimension_semantics<parallel>], iteration_bounds = array<i64: 1>, scalar_prefetch = 0 : i64, scratch_operands = 0 : i64, tpu.core_type = #tpu.core_type<tc>, window_params = [{transform_indices = @transform_0, window_bounds = array<i64: 16, 5>}, {transform_indices = @transform_1, window_bounds = array<i64: 2, 8, 1>}, {transform_indices = @transform_2, window_bounds = array<i64: 2, 8, 8>}, {pipeline_mode = #tpu.pipeline_mode<synchronous>, transform_indices = @transform_3, window_bounds = array<i64: 5, 32>}, {pipeline_mode = #tpu.pipeline_mode<synchronous>, transform_indices = @transform_4, window_bounds = array<i64: 1, 32>}, {pipeline_mode = #tpu.pipeline_mode<synchronous>, transform_indices = @transform_5, window_bounds = array<i64: 32, 32>}, {pipeline_mode = #tpu.pipeline_mode<synchronous>, transform_indices = @transform_6, window_bounds = array<i64: 32, 32>}, {pipeline_mode = #tpu.pipeline_mode<synchronous>, transform_indices = @transform_7, window_bounds = array<i64: 32, 32>}, {pipeline_mode = #tpu.pipeline_mode<synchronous>, transform_indices = @transform_8, window_bounds = array<i64: 32, 32>}, {pipeline_mode = #tpu.pipeline_mode<synchronous>, transform_indices = @transform_9, window_bounds = array<i64: 32, 128>}, {pipeline_mode = #tpu.pipeline_mode<synchronous>, transform_indices = @transform_10, window_bounds = array<i64: 128, 32>}, {pipeline_mode = #tpu.pipeline_mode<synchronous>, transform_indices = @transform_11, window_bounds = array<i64: 32, 5>}, {pipeline_mode = #tpu.pipeline_mode<synchronous>, transform_indices = @transform_12, window_bounds = array<i64: 32, 3>}, {transform_indices = @transform_13, window_bounds = array<i64: 2, 8, 8>}]} {
    %c0 = arith.constant 0 : index
    %c0_0 = arith.constant 0 : index
    %c0_1 = arith.constant 0 : index
    %0 = vector.load %arg2[%c0, %c0_0, %c0_1] : memref<2x8x1xf32, #tpu.memory_space<vmem>>, vector<2x8x1xf32>
    %c0_2 = arith.constant 0 : index
    %c0_3 = arith.constant 0 : index
    %1 = vector.load %arg1[%c0_2, %c0_3] : memref<16x5xbf16, #tpu.memory_space<vmem>>, vector<16x5xbf16>
    %c0_4 = arith.constant 0 : index
    %c0_5 = arith.constant 0 : index
    %2 = vector.load %arg4[%c0_4, %c0_5] : memref<5x32xbf16, #tpu.memory_space<vmem>>, vector<5x32xbf16>
    %cst = arith.constant dense<0.000000e+00> : vector<16x32xf32>
    %3 = tpu.matmul %1, %2, %cst {dimension_numbers = #tpu.dot_dimension_numbers<[1], [0], [0], [1], [0, 0, 1, 1], [], []>} : vector<16x5xbf16>, vector<5x32xbf16>, vector<16x32xf32> -> vector<16x32xf32>
    %c0_6 = arith.constant 0 : index
    %c0_7 = arith.constant 0 : index
    %4 = vector.load %arg5[%c0_6, %c0_7] : memref<1x32xf32, #tpu.memory_space<vmem>>, vector<1x32xf32>
    %5 = vector.broadcast %4 : vector<1x32xf32> to vector<16x32xf32>
    %6 = arith.addf %3, %5 : vector<16x32xf32>
    %7 = arith.truncf %6 : vector<16x32xf32> to vector<16x32xbf16>
    %c0_8 = arith.constant 0 : index
    %c0_9 = arith.constant 0 : index
    %8 = vector.load %arg6[%c0_8, %c0_9] : memref<32x32xbf16, #tpu.memory_space<vmem>>, vector<32x32xbf16>
    %cst_10 = arith.constant dense<0.000000e+00> : vector<16x32xf32>
    %9 = tpu.matmul %7, %8, %cst_10 {dimension_numbers = #tpu.dot_dimension_numbers<[1], [0], [0], [1], [0, 0, 1, 1], [], []>} : vector<16x32xbf16>, vector<32x32xbf16>, vector<16x32xf32> -> vector<16x32xf32>
    %c0_11 = arith.constant 0 : index
    %c0_12 = arith.constant 0 : index
    %10 = vector.load %arg7[%c0_11, %c0_12] : memref<32x32xbf16, #tpu.memory_space<vmem>>, vector<32x32xbf16>
    %cst_13 = arith.constant dense<0.000000e+00> : vector<16x32xf32>
    %11 = tpu.matmul %7, %10, %cst_13 {dimension_numbers = #tpu.dot_dimension_numbers<[1], [0], [0], [1], [0, 0, 1, 1], [], []>} : vector<16x32xbf16>, vector<32x32xbf16>, vector<16x32xf32> -> vector<16x32xf32>
    %c0_14 = arith.constant 0 : index
    %c0_15 = arith.constant 0 : index
    %12 = vector.load %arg8[%c0_14, %c0_15] : memref<32x32xbf16, #tpu.memory_space<vmem>>, vector<32x32xbf16>
    %cst_16 = arith.constant dense<0.000000e+00> : vector<16x32xf32>
    %13 = tpu.matmul %7, %12, %cst_16 {dimension_numbers = #tpu.dot_dimension_numbers<[1], [0], [0], [1], [0, 0, 1, 1], [], []>} : vector<16x32xbf16>, vector<32x32xbf16>, vector<16x32xf32> -> vector<16x32xf32>
    %14 = arith.truncf %9 : vector<16x32xf32> to vector<16x32xbf16>
    %15 = vector.shape_cast %14 : vector<16x32xbf16> to vector<2x8x32xbf16>
    %16 = arith.truncf %11 : vector<16x32xf32> to vector<16x32xbf16>
    %17 = vector.shape_cast %16 : vector<16x32xbf16> to vector<2x8x32xbf16>
    %18 = arith.truncf %13 : vector<16x32xf32> to vector<16x32xbf16>
    %19 = vector.shape_cast %18 : vector<16x32xbf16> to vector<2x8x32xbf16>
    %c0_17 = arith.constant 0 : index
    %c0_18 = arith.constant 0 : index
    %c0_19 = arith.constant 0 : index
    %20 = vector.load %arg3[%c0_17, %c0_18, %c0_19] : memref<2x8x8xbf16, #tpu.memory_space<vmem>>, vector<2x8x8xbf16>
    %21 = arith.extf %20 : vector<2x8x8xbf16> to vector<2x8x8xf32>
    %cst_20 = arith.constant -1.000000e+08 : f32
    %22 = vector.broadcast %cst_20 : f32 to vector<2x8x8xf32>
    %23 = arith.cmpf ogt, %21, %22 : vector<2x8x8xf32>
    %24 = arith.extui %23 : vector<2x8x8xi1> to vector<2x8x8xi32>
    %25 = arith.sitofp %24 : vector<2x8x8xi32> to vector<2x8x8xf32>
    "tpu.trace_start"() <{level = 10 : i32, message = "bqd,bkd->bqk"}> : () -> ()
    %cst_21 = arith.constant dense<0.000000e+00> : vector<2x8x8xf32>
    %26 = tpu.matmul %15, %17, %cst_21 {dimension_numbers = #tpu.dot_dimension_numbers<[2], [2], [1], [1], [0, 0, 0, 1, 1, 1], [0], [0]>} : vector<2x8x32xbf16>, vector<2x8x32xbf16>, vector<2x8x8xf32> -> vector<2x8x8xf32>
    "tpu.trace_stop"() : () -> ()
    %27 = arith.addf %26, %21 : vector<2x8x8xf32>
    %cst_22 = arith.constant dense<0xFF800000> : vector<2x8xf32>
    %28 = vector.multi_reduction <maximumf>, %27, %cst_22 [2] : vector<2x8x8xf32> to vector<2x8xf32>
    %29 = vector.shape_cast %28 : vector<2x8xf32> to vector<2x8x1xf32>
    %30 = vector.broadcast %29 : vector<2x8x1xf32> to vector<2x8x8xf32>
    %31 = arith.subf %27, %30 : vector<2x8x8xf32>
    %32 = math.exp %31 : vector<2x8x8xf32>
    %33 = arith.mulf %32, %25 : vector<2x8x8xf32>
    %cst_23 = arith.constant dense<0.000000e+00> : vector<2x8xf32>
    %34 = vector.multi_reduction <add>, %33, %cst_23 [2] : vector<2x8x8xf32> to vector<2x8xf32>
    %35 = vector.shape_cast %34 : vector<2x8xf32> to vector<2x8x1xf32>
    %cst_24 = arith.constant 9.99999971E-10 : f32
    %36 = vector.broadcast %cst_24 : f32 to vector<2x8x1xf32>
    %37 = arith.addf %35, %36 : vector<2x8x1xf32>
    %38 = tpu.reciprocal %37 {approx = true} : vector<2x8x1xf32> -> vector<2x8x1xf32>
    %39 = vector.broadcast %38 : vector<2x8x1xf32> to vector<2x8x8xf32>
    %40 = arith.mulf %33, %39 : vector<2x8x8xf32>
    %41 = arith.truncf %40 : vector<2x8x8xf32> to vector<2x8x8xbf16>
    "tpu.trace_start"() <{level = 10 : i32, message = "bqk,bkd->bqd"}> : () -> ()
    %cst_25 = arith.constant dense<0.000000e+00> : vector<2x8x32xf32>
    %42 = tpu.matmul %41, %19, %cst_25 {dimension_numbers = #tpu.dot_dimension_numbers<[2], [1], [1], [2], [0, 0, 0, 1, 1, 2], [0], [0]>} : vector<2x8x8xbf16>, vector<2x8x32xbf16>, vector<2x8x32xf32> -> vector<2x8x32xf32>
    "tpu.trace_stop"() : () -> ()
    %43 = vector.shape_cast %42 : vector<2x8x32xf32> to vector<16x32xf32>
    %44 = arith.truncf %43 : vector<16x32xf32> to vector<16x32xbf16>
    %c0_26 = arith.constant 0 : index
    %c0_27 = arith.constant 0 : index
    %45 = vector.load %arg9[%c0_26, %c0_27] : memref<32x32xbf16, #tpu.memory_space<vmem>>, vector<32x32xbf16>
    %cst_28 = arith.constant dense<0.000000e+00> : vector<16x32xf32>
    %46 = tpu.matmul %44, %45, %cst_28 {dimension_numbers = #tpu.dot_dimension_numbers<[1], [0], [0], [1], [0, 0, 1, 1], [], []>} : vector<16x32xbf16>, vector<32x32xbf16>, vector<16x32xf32> -> vector<16x32xf32>
    %47 = arith.addf %6, %46 : vector<16x32xf32>
    %48 = arith.truncf %47 : vector<16x32xf32> to vector<16x32xbf16>
    %c0_29 = arith.constant 0 : index
    %c0_30 = arith.constant 0 : index
    %49 = vector.load %arg10[%c0_29, %c0_30] : memref<32x128xbf16, #tpu.memory_space<vmem>>, vector<32x128xbf16>
    %cst_31 = arith.constant dense<0.000000e+00> : vector<16x128xf32>
    %50 = tpu.matmul %48, %49, %cst_31 {dimension_numbers = #tpu.dot_dimension_numbers<[1], [0], [0], [1], [0, 0, 1, 1], [], []>} : vector<16x32xbf16>, vector<32x128xbf16>, vector<16x128xf32> -> vector<16x128xf32>
    %cst_32 = arith.constant 0.000000e+00 : f32
    %51 = vector.broadcast %cst_32 : f32 to vector<16x128xf32>
    %52 = arith.maximumf %50, %51 : vector<16x128xf32>
    %53 = arith.truncf %52 : vector<16x128xf32> to vector<16x128xbf16>
    %c0_33 = arith.constant 0 : index
    %c0_34 = arith.constant 0 : index
    %54 = vector.load %arg11[%c0_33, %c0_34] : memref<128x32xbf16, #tpu.memory_space<vmem>>, vector<128x32xbf16>
    %cst_35 = arith.constant dense<0.000000e+00> : vector<16x32xf32>
    %55 = tpu.matmul %53, %54, %cst_35 {dimension_numbers = #tpu.dot_dimension_numbers<[1], [0], [0], [1], [0, 0, 1, 1], [], []>} : vector<16x128xbf16>, vector<128x32xbf16>, vector<16x32xf32> -> vector<16x32xf32>
    %56 = arith.addf %47, %55 : vector<16x32xf32>
    %57 = arith.truncf %56 : vector<16x32xf32> to vector<16x32xbf16>
    %c0_36 = arith.constant 0 : index
    %c0_37 = arith.constant 0 : index
    %58 = vector.load %arg12[%c0_36, %c0_37] : memref<32x5xbf16, #tpu.memory_space<vmem>>, vector<32x5xbf16>
    %cst_38 = arith.constant dense<0.000000e+00> : vector<16x5xf32>
    %59 = tpu.matmul %57, %58, %cst_38 {dimension_numbers = #tpu.dot_dimension_numbers<[1], [0], [0], [1], [0, 0, 1, 1], [], []>} : vector<16x32xbf16>, vector<32x5xbf16>, vector<16x5xf32> -> vector<16x5xf32>
    %60 = vector.shape_cast %59 : vector<16x5xf32> to vector<2x8x5xf32>
    %61 = vector.broadcast %0 : vector<2x8x1xf32> to vector<2x8x5xf32>
    %62 = arith.mulf %60, %61 : vector<2x8x5xf32>
    %c0_39 = arith.constant 0 : index
    %c0_40 = arith.constant 0 : index
    %63 = vector.load %arg13[%c0_39, %c0_40] : memref<32x3xbf16, #tpu.memory_space<vmem>>, vector<32x3xbf16>
    %cst_41 = arith.constant dense<0.000000e+00> : vector<16x3xf32>
    %64 = tpu.matmul %57, %63, %cst_41 {dimension_numbers = #tpu.dot_dimension_numbers<[1], [0], [0], [1], [0, 0, 1, 1], [], []>} : vector<16x32xbf16>, vector<32x3xbf16>, vector<16x3xf32> -> vector<16x3xf32>
    %65 = math.tanh %64 : vector<16x3xf32>
    %66 = vector.shape_cast %65 : vector<16x3xf32> to vector<2x8x3xf32>
    %67 = vector.broadcast %0 : vector<2x8x1xf32> to vector<2x8x3xf32>
    %68 = arith.mulf %66, %67 : vector<2x8x3xf32>
    %cst_42 = arith.constant dense<0.000000e+00> : vector<2x1xf32>
    %69 = vector.multi_reduction <add>, %0, %cst_42 [1] : vector<2x8x1xf32> to vector<2x1xf32>
    %70 = vector.shape_cast %69 : vector<2x1xf32> to vector<2x1x1xf32>
    %cst_43 = arith.constant 1.000000e+00 : f32
    %71 = vector.broadcast %cst_43 : f32 to vector<2x1x1xf32>
    %72 = arith.maximumf %70, %71 : vector<2x1x1xf32>
    %cst_44 = arith.constant dense<0.000000e+00> : vector<2x3xf32>
    %73 = vector.multi_reduction <add>, %68, %cst_44 [1] : vector<2x8x3xf32> to vector<2x3xf32>
    %74 = vector.shape_cast %73 : vector<2x3xf32> to vector<2x1x3xf32>
    %75 = vector.broadcast %72 : vector<2x1x1xf32> to vector<2x1x3xf32>
    %76 = arith.divf %74, %75 : vector<2x1x3xf32>
    %77 = vector.broadcast %76 : vector<2x1x3xf32> to vector<2x8x3xf32>
    %78 = arith.subf %68, %77 : vector<2x8x3xf32>
    %79 = vector.broadcast %0 : vector<2x8x1xf32> to vector<2x8x3xf32>
    %80 = arith.mulf %78, %79 : vector<2x8x3xf32>
    %81 = tpu.concatenate %80, %62 in 2 : vector<2x8x3xf32>, vector<2x8x5xf32> -> vector<2x8x8xf32>
    %c0_45 = arith.constant 0 : index
    %c0_46 = arith.constant 0 : index
    %c0_47 = arith.constant 0 : index
    %82 = vector.load %arg14[%c0_45, %c0_46, %c0_47] : memref<2x8x8xf32, #tpu.memory_space<vmem>>, vector<2x8x8xf32>
    tpu.vector_store %arg14[%c0_45, %c0_46, %c0_47], %81 {strides = array<i32>} : memref<2x8x8xf32, #tpu.memory_space<vmem>>, vector<2x8x8xf32>,
    return
  }
  func.func @transform_0(%arg0: i32) -> (i32, i32) {
    %c0_i32 = arith.constant 0 : i32
    %c0_i32_0 = arith.constant 0 : i32
    return %arg0, %c0_i32 : i32, i32
  }
  func.func @transform_1(%arg0: i32) -> (i32, i32, i32) {
    %c0_i32 = arith.constant 0 : i32
    %c0_i32_0 = arith.constant 0 : i32
    %c0_i32_1 = arith.constant 0 : i32
    return %arg0, %c0_i32, %c0_i32_0 : i32, i32, i32
  }
  func.func @transform_2(%arg0: i32) -> (i32, i32, i32) {
    %c0_i32 = arith.constant 0 : i32
    %c0_i32_0 = arith.constant 0 : i32
    %c0_i32_1 = arith.constant 0 : i32
    return %arg0, %c0_i32, %c0_i32_0 : i32, i32, i32
  }
  func.func @transform_3(%arg0: i32) -> (i32, i32) {
    %c0_i32 = arith.constant 0 : i32
    %c0_i32_0 = arith.constant 0 : i32
    %c0_i32_1 = arith.constant 0 : i32
    return %c0_i32, %c0_i32_0 : i32, i32
  }
  func.func @transform_4(%arg0: i32) -> (i32, i32) {
    %c0_i32 = arith.constant 0 : i32
    %c0_i32_0 = arith.constant 0 : i32
    %c0_i32_1 = arith.constant 0 : i32
    return %c0_i32, %c0_i32_0 : i32, i32
  }
  func.func @transform_5(%arg0: i32) -> (i32, i32) {
    %c0_i32 = arith.constant 0 : i32
    %c0_i32_0 = arith.constant 0 : i32
    %c0_i32_1 = arith.constant 0 : i32
    return %c0_i32, %c0_i32_0 : i32, i32
  }
  func.func @transform_6(%arg0: i32) -> (i32, i32) {
    %c0_i32 = arith.constant 0 : i32
    %c0_i32_0 = arith.constant 0 : i32
    %c0_i32_1 = arith.constant 0 : i32
    return %c0_i32, %c0_i32_0 : i32, i32
  }
  func.func @transform_7(%arg0: i32) -> (i32, i32) {
    %c0_i32 = arith.constant 0 : i32
    %c0_i32_0 = arith.constant 0 : i32
    %c0_i32_1 = arith.constant 0 : i32
    return %c0_i32, %c0_i32_0 : i32, i32
  }
  func.func @transform_8(%arg0: i32) -> (i32, i32) {
    %c0_i32 = arith.constant 0 : i32
    %c0_i32_0 = arith.constant 0 : i32
    %c0_i32_1 = arith.constant 0 : i32
    return %c0_i32, %c0_i32_0 : i32, i32
  }
  func.func @transform_9(%arg0: i32) -> (i32, i32) {
    %c0_i32 = arith.constant 0 : i32
    %c0_i32_0 = arith.constant 0 : i32
    %c0_i32_1 = arith.constant 0 : i32
    return %c0_i32, %c0_i32_0 : i32, i32
  }
  func.func @transform_10(%arg0: i32) -> (i32, i32) {
    %c0_i32 = arith.constant 0 : i32
    %c0_i32_0 = arith.constant 0 : i32
    %c0_i32_1 = arith.constant 0 : i32
    return %c0_i32, %c0_i32_0 : i32, i32
  }
  func.func @transform_11(%arg0: i32) -> (i32, i32) {
    %c0_i32 = arith.constant 0 : i32
    %c0_i32_0 = arith.constant 0 : i32
    %c0_i32_1 = arith.constant 0 : i32
    return %c0_i32, %c0_i32_0 : i32, i32
  }
  func.func @transform_12(%arg0: i32) -> (i32, i32) {
    %c0_i32 = arith.constant 0 : i32
    %c0_i32_0 = arith.constant 0 : i32
    %c0_i32_1 = arith.constant 0 : i32
    return %c0_i32, %c0_i32_0 : i32, i32
  }
  func.func @transform_13(%arg0: i32) -> (i32, i32, i32) {
    %c0_i32 = arith.constant 0 : i32
    %c0_i32_0 = arith.constant 0 : i32
    %c0_i32_1 = arith.constant 0 : i32
    return %arg0, %c0_i32, %c0_i32_0 : i32, i32, i32
  }
}

</mosaic_0001>

<bundles_post_ra>
// kernel: transformer_dynamics_forward.1
= control target key start
LH: loop header
LB: loop body
LE: loop exit
PB: predicated region body
PF: predicated region fallthrough
CT: control target
= control target key end

     0   :  { %vm64_vm0 = vcmask 1041408   ;;  %vm65_vm1 = vcmask 1042432   ;;  %v827_v1 = vmov 65535   ;;  %s1032_s0 = inlined_call_operand.vmem [shape: bf16[16,5], index: 0, kind: input, shape index: {}]   ;;  %s1033_s1 = inlined_call_operand.vmem [shape: f32[2,8,1], index: 1, kind: input, shape index: {}]   ;;  %s1034_s2 = inlined_call_operand.vmem [shape: bf16[2,8,8], index: 2, kind: input, shape index: {}]   ;;  %s1035_s3 = inlined_call_operand.vmem [shape: bf16[5,32], index: 3, kind: input, shape index: {}]   ;;  %s1036_s4 = inlined_call_operand.vmem [shape: f32[1,32], index: 4, kind: input, shape index: {}]   ;;  %s1037_s5 = inlined_call_operand.vmem [shape: bf16[32,32], index: 5, kind: input, shape index: {}]   ;;  %s1038_s6 = inlined_call_operand.vmem [shape: bf16[32,32], index: 6, kind: input, shape index: {}]   ;;  %s1039_s7 = inlined_call_operand.vmem [shape: bf16[32,32], index: 7, kind: input, shape index: {}]   ;;  %s1040_s8 = inlined_call_operand.vmem [shape: bf16[32,32], index: 8, kind: input, shape index: {}]   ;;  %s1041_s9 = inlined_call_operand.vmem [shape: bf16[32,128], index: 9, kind: input, shape index: {}]   ;;  %s1042_s10 = inlined_call_operand.vmem [shape: bf16[128,32], index: 10, kind: input, shape index: {}]   ;;  %s1043_s11 = inlined_call_operand.vmem [shape: bf16[32,5], index: 11, kind: input, shape index: {}]   ;;  %s1044_s12 = inlined_call_operand.vmem [shape: bf16[32,3], index: 12, kind: input, shape index: {}]   ;;  %s1045_s13 = inlined_call_operand.hbm [shape: f32[2,8,8], index: 13, kind: output, shape index: {}]  }
   0x1   :  { %v50_v0 = vld [vmem:[%s1035_s3] sm:$0x7]  ;;  %v66_v2 = vsel %vm64_vm0, 4294967295, %v827_v1 }
   0x2   :  { %v67_v3 = vsel %vm65_vm1, %v66_v2, 0 }
   0x3   :  { %18 = vsyncpa [#allocation3], 0  ;;  %v69_v4 = vand.u32 %v67_v3, %v50_v0  ;;  %v747_v5 = vld [vmem:[%s1032_s0] sm:$0xff]  ;;  %vm60_vm2 = vcmask 39936   ;;  %v749_v6 = vld [vmem:[%s1037_s5 + $0x8] sm:$0xff]  ;;  %vm102_vm3 = vcmask 261120  }
   0x4   :  { %v751_v7 = vld [vmem:[%s1038_s6 + $0x8] sm:$0xff]  ;;  %112 = vmatpush.bf16.msra.mxu1 %v749_v6  ;;  %v748_v9 = vld [vmem:[%s1037_s5] sm:$0xff]  ;;  %vm266_vm4 = vcmask 1043456   ;;  %vm234_vm5 = vcmask 64512   ;;  %v828_v50 = vmov 0.0   ;;  %vm535_vm8 = vcmask 7168  }
   0x5   :  { %78 = vmatpush.bf16.msra.mxu0 %v69_v4  ;;  %v753_v8 = vld [vmem:[%s1039_s7 + $0x8] sm:$0xff]  ;;  %142 = vmatpush.bf16.msra.mxu2 %v751_v7  ;;  %v750_v10 = vld [vmem:[%s1038_s6] sm:$0xff]  ;;  %vm552_vm9 = vcmask 23552   ;;  %s629_s14 = sshll.u32 %s1045_s13, 4  ;;  %s832_s3 = smov 128   ;;  %s630_s14 = int_to_ptr.hbm [resolvable:$true] %s629_s14 }
   0x6   :  { %172 = vmatpush.bf16.msra.mxu3 %v753_v8  ;;  %v752_v11 = vld [vmem:[%s1039_s7] sm:$0xff]  ;;  %v755_v6 = vld [vmem:[%s1040_s8 + $0x8] sm:$0xff]  ;;  %s833_s15 = smov 8  }
   0x7   :  { %v784_v13 = vld [vmem:[%s1036_s4] ss:$0 sm:$0xff] }
   0x8   :  { %645 = vmatmul.msk.bf16.vlgmr.msra.gmra.mxu0 %vm60_vm2, %v747_v5  ;;  %113 = vmatpush.bf16.msra.mxu1 %v748_v9  ;;  %v771_v34 = vld [vmem:[%s1034_s2] sm:$0xff]  }
   0x9   :  { %143 = vmatpush.bf16.msra.mxu2 %v750_v10  ;;  %v772_v35 = vunpack.c.l.bf16 %v771_v34  ;;  %v773_v39 = vunpack.c.h.bf16 %v771_v34  ;;  %v754_v7 = vld [vmem:[%s1040_s8] sm:$0xff]  ;;  %v769_v34 = vld [vmem:[%s1044_s12 + $0x8] sm:$0xff] }
   0xa   :  { %173 = vmatpush.bf16.msra.mxu3 %v752_v11 }
   0xb   :  { %vm190_vm6 = vcmp.gt.f32.partialorder %v772_v35, -1e+08  ;;  %vm191_vm7 = vcmp.gt.f32.partialorder %v773_v39, -1e+08 }
   0xc   :  { %v673_v51 = vsel %vm190_vm6, 1.0, %v828_v50  ;;  %v674_v56 = vsel %vm191_vm7, 1.0, %v828_v50 }
  0x85   :  { %v80_v12 = vpop.f32.mrf.mxu0 }
  0x86   :  { %v931_v15 = vadd.f32 %v784_v13, %v80_v12 }
  0x8d   :  { %v82_v14 = vpop.f32.mrf.mxu0 }
  0x8e   :  { %v933_v16 = vadd.f32 %v784_v13, %v82_v14  ;;  %v757_v13 = vld [vmem:[%s1041_s9 + $0x8] sm:$0xff]  ;;  %v756_v14 = vld [vmem:[%s1041_s9] sm:$0xff] }
  0x90   :  { %v85_v17 = vpack.c.bf16 %v933_v16, %v931_v15 }
  0x92   :  { %654 = vmatmul.msk.bf16.vlgmr.msra.gmra.mxu1 %vm102_vm3, %v85_v17  ;;  %663 = vmatmul.msk.bf16.vlgmr.msra.gmra.mxu2 %vm102_vm3, %v85_v17 }
  0x93   :  { %672 = vmatmul.msk.bf16.vlgmr.msra.gmra.mxu3 %vm102_vm3, %v85_v17  ;;  %v765_v17 = vld [vmem:[%s1042_s10 + $0x38] sm:$0xff] }
 0x10f   :  { %v115_v23 = vpop.f32.mrf.mxu1 }
 0x110   :  { %v180_v26 = vpack.c.bf16 %v115_v23, %v115_v23 }
 0x115   :  { %v145_v18 = vpop.f32.mrf.mxu2 }
 0x116   :  { %v182_v19 = vpack.c.bf16 %v145_v18, %v145_v18  ;;  %v175_v20 = vpop.f32.mrf.mxu3  ;;  %v764_v18 = vld [vmem:[%s1042_s10 + $0x30] sm:$0xff] }
 0x117   :  { %v184_v21 = vpack.c.bf16 %v175_v20, %v175_v20  ;;  %v117_v32 = vpop.f32.mrf.mxu1  ;;  %v762_v20 = vld [vmem:[%s1042_s10 + $0x20] sm:$0xff] }
 0x118   :  { %v200_v22 = vsel %vm102_vm3, %v182_v19, 0  ;;  %v181_v33 = vpack.c.bf16 %v117_v32, %v117_v32  ;;  %v763_v19 = vld [vmem:[%s1042_s10 + $0x28] sm:$0xff] }
 0x119   :  { %209 = vmatpush.bf16.xpose.msrb.mxu0 %v200_v22  ;;  %v268_v24 = vsel %vm266_vm4, %v184_v21, 0  ;;  %v761_v21 = vld [vmem:[%s1042_s10 + $0x18] sm:$0xff] }
 0x11a   :  { %277 = vmatpush.bf16.msrb.mxu2 %v268_v24 }
 0x11d   :  { %v147_v25 = vpop.f32.mrf.mxu2 }
 0x11e   :  { %v183_v27 = vpack.c.bf16 %v147_v25, %v147_v25  ;;  %v177_v28 = vpop.f32.mrf.mxu3  ;;  %439 = vmatpush.bf16.msra.mxu2 %v765_v17 }
 0x11f   :  { %v185_v29 = vpack.c.bf16 %v177_v28, %v177_v28  ;;  %v759_v28 = vld [vmem:[%s1042_s10 + $0x8] sm:$0xff] }
 0x120   :  { %675 = vmatmul.msk.bf16.vlgmr.msrb.gmra.mxu0 %vm102_vm3, %v180_v26  ;;  %v219_v30 = vsel %vm102_vm3, %v183_v27, 0  ;;  %v760_v27 = vld [vmem:[%s1042_s10 + $0x10] sm:$0xff] }
 0x121   :  { %228 = vmatpush.bf16.xpose.msrb.mxu1 %v219_v30  ;;  %v287_v31 = vsel %vm266_vm4, %v185_v29, 0  ;;  %328 = vmatpush.bf16.msra.mxu0 %v755_v6  ;;  %v758_v29 = vld [vmem:[%s1042_s10] sm:$0xff] }
 0x122   :  { %296 = vmatpush.bf16.msrb.mxu3 %v287_v31  ;;  %440 = vmatpush.bf16.msra.mxu2 %v764_v18 }
 0x125   :  { %329 = vmatpush.bf16.msra.mxu0 %v754_v7 }
 0x126   :  { %441 = vmatpush.bf16.msra.mxu2 %v763_v19 }
 0x128   :  { %676 = vmatmul.msk.bf16.vlgmr.msrb.gmra.mxu1 %vm102_vm3, %v181_v33  ;;  %v767_v33 = vld [vmem:[%s1043_s11 + $0x8] sm:$0xff] }
 0x129   :  { %364 = vmatpush.bf16.msra.mxu1 %v757_v13  ;;  %481 = vmatpush.bf16.msra.mxu3 %v767_v33 }
 0x12a   :  { %442 = vmatpush.bf16.msra.mxu2 %v762_v20  ;;  %523 = vmatpush.bf16.msrb.mxu0 %v769_v34 }
 0x12d   :  { %365 = vmatpush.bf16.msra.mxu1 %v756_v14 }
 0x12e   :  { %443 = vmatpush.bf16.msra.mxu2 %v761_v21 }
 0x132   :  { %444 = vmatpush.bf16.msra.mxu2 %v760_v27 }
 0x136   :  { %445 = vmatpush.bf16.msra.mxu2 %v759_v28 }
 0x13a   :  { %446 = vmatpush.bf16.msra.mxu2 %v758_v29 }
 0x19d   :  { %v211_v36 = vpop.f32.mrf.mxu0 }
 0x19e   :  { %v212_v37 = vadd.f32 %v772_v35, %v211_v36  ;;  %v766_v35 = vld [vmem:[%s1043_s11] sm:$0xff]  ;;  %s831_s11 = smov [#allocation2]  }
 0x19f   :  { %v768_v36 = vld [vmem:[%s1044_s12] sm:$0xff]  ;;  %482 = vmatpush.bf16.msra.mxu3 %v766_v35  ;;  %s627_s12 = sshll.u32 %s831_s11, 4  ;;  %s628_s12 = int_to_ptr.vmem [resolvable:$true] %s627_s12 }
 0x1a0   :  { %v235_v38 = vsel %vm234_vm5, %v212_v37, -inf  ;;  %524 = vmatpush.bf16.msrb.mxu0 %v768_v36 }
 0x1a1   :  { %236 = vmax.xlane.f32.xlu0 %v235_v38  ;;  %v47_v38 = vld [vmem:[%s1033_s1 + $0x8] sm:$0xff] }
 0x1a5   :  { %v213_v40 = vpop.f32.mrf.mxu0  ;;  %v230_v41 = vpop.f32.mrf.mxu1 }
 0x1a6   :  { %v231_v42 = vadd.f32 %v773_v39, %v230_v41  ;;  %v829_v39 = vmov 0   ;;  %v543_v41 = vsel %vm535_vm8, %v47_v38, 0.0 }
 0x1a7   :  { %782 = vset.pattern.permute.xlu0 %v829_v39  ;;  %783 = vset.pattern.permute.xlu1 %v829_v39 }
 0x1a8   :  { %v238_v43 = vsel %vm234_vm5, %v231_v42, -inf  ;;  %781 = vset.pattern.permute.xlu2 %v829_v39 }
 0x1a9   :  { %239 = vmax.xlane.f32.xlu0 %v238_v43  ;;  %v544_v43 = vrot.slane %v543_v41, 4 }
 0x1ad   :  { %v232_v44 = vpop.f32.mrf.mxu1 }
 0x214   :  { %v237_v45 = vpop.xlane.xlu0 %236 }
 0x215   :  { %v241_v46 = vsub.f32 %v212_v37, %v237_v45  ;;  %v46_v37 = vld [vmem:[%s1033_s1] sm:$0xff]  ;;  %v545_v45 = vadd.f32 %v544_v43, %v543_v41  ;;  %s830_s1 = smov 3  }
 0x216   :  { %v536_v40 = vsel %vm535_vm8, %v46_v37, 0.0  ;;  %491 = vperm.xlu2 %781, %v46_v37  }
 0x217   :  { %v243_v47 = vmul.f32 1.442695, %v241_v46 }
 0x219   :  { %785 = vpow2.f32 %v243_v47  ;;  %v546_v47 = vrot.slane %v545_v45, 2 }
 0x21c   :  { %v240_v48 = vpop.xlane.xlu0 %239 }
 0x21d   :  { %v242_v49 = vsub.f32 %v231_v42, %v240_v48  ;;  %v537_v42 = vrot.slane %v536_v40, 4 }
 0x21e   :  { %496 = vperm.xlu2 %781, %v47_v38  }
 0x21f   :  { %v786_v52 = vpop.eup %785  ;;  %v245_v53 = vmul.f32 1.442695, %v242_v49  ;;  %v538_v44 = vadd.f32 %v537_v42, %v536_v40  ;;  %v547_v49 = vadd.f32 %v546_v47, %v545_v45 }
 0x220   :  { %v247_v54 = vmul.f32 %v786_v52, %v673_v51 }
 0x221   :  { %787 = vpow2.f32 %v245_v53  ;;  %v539_v46 = vrot.slane %v538_v44, 2  ;;  %v548_v51 = vrot.slane %v547_v49, 1 }
 0x222   :  { %v249_v55 = vsel %vm234_vm5, %v247_v54, 0.0 }
 0x223   :  { %250 = vadd.xlane.f32.xlu1 %v249_v55  ;;  %v540_v48 = vadd.f32 %v539_v46, %v538_v44  ;;  %v549_v53 = vadd.f32 %v548_v51, %v547_v49 }
 0x225   :  { %v541_v50 = vrot.slane %v540_v48, 1  ;;  %v551_v55 = vmax.f32 %v549_v53, 1.0 }
 0x227   :  { %v788_v57 = vpop.eup %787  ;;  %v542_v52 = vadd.f32 %v541_v50, %v540_v48 }
 0x228   :  { %v248_v58 = vmul.f32 %v788_v57, %v674_v56 }
 0x22a   :  { %v252_v59 = vsel %vm234_vm5, %v248_v58, 0.0 }
 0x22b   :  { %253 = vadd.xlane.f32.xlu1 %v252_v59 }
 0x244   :  { %574 = vperm.xlu1 %783, %v551_v55  }
 0x296   :  { %v251_v60 = vpop.xlane.xlu1 %250 }
 0x297   :  { %v255_v61 = vadd.f32 1e-09, %v251_v60 }
 0x299   :  { %789 = vrcp.f32 %v255_v61  ;;  %v1013_v61 = vpop.permute.xlu2 %491 }
 0x29e   :  { %v254_v62 = vpop.xlane.xlu1 %253 }
 0x29f   :  { %v790_v63 = vpop.eup %789  ;;  %v256_v0 = vadd.f32 1e-09, %v254_v62 }
 0x2a0   :  { %v259_v1 = vmul.f32 %v790_v63, %v247_v54  ;;  %v550_v54 = vmax.f32 %v542_v52, 1.0 }
 0x2a1   :  { %791 = vrcp.f32 %v256_v0 }
 0x2a2   :  { %v261_v2 = vpack.c.bf16 %v259_v1, %v259_v1  ;;  %569 = vperm.xlu0 %782, %v550_v54   ;;  %v1016_v1 = vpop.permute.xlu2 %496 }
 0x2a4   :  { %677 = vmatmul.msk.bf16.vlgmr.msrb.gmra.mxu2 %vm234_vm5, %v261_v2 }
 0x2a7   :  { %v792_v3 = vpop.eup %791 }
 0x2a8   :  { %v260_v4 = vmul.f32 %v792_v3, %v248_v58 }
 0x2aa   :  { %v262_v5 = vpack.c.bf16 %v260_v4, %v260_v4 }
 0x2ac   :  { %678 = vmatmul.msk.bf16.vlgmr.msrb.gmra.mxu3 %vm234_vm5, %v262_v5 }
 0x314   :  { %v570_v6 = vpop.permute.xlu0 %569 }
 0x315   :  { %vm582_vm10 = vweird.f32 %v570_v6  ;;  %v588_v27 = vand.u32 2147483648, %v570_v6  ;;  %v586_v29 = vand.u32 2147483647, %v570_v6 }
 0x317   :  { %vm587_vm13 = vcmp.eq.f32.partialorder %v586_v29, 8.507059e+37 }
 0x327   :  { %v279_v8 = vpop.f32.mrf.mxu2 }
 0x32f   :  { %v281_v9 = vpop.f32.mrf.mxu2  ;;  %v298_v10 = vpop.f32.mrf.mxu3 }
 0x330   :  { %v302_v11 = vpack.c.bf16 %v298_v10, %v279_v8  ;;  %v575_v10 = vpop.permute.xlu1 %574 }
 0x331   :  { %vm597_vm14 = vweird.f32 %v575_v10  ;;  %v603_v37 = vand.u32 2147483648, %v575_v10  ;;  %v601_v39 = vand.u32 2147483647, %v575_v10 }
 0x332   :  { %687 = vmatmul.msk.bf16.vlgmr.msra.gmra.mxu0 %vm102_vm3, %v302_v11 }
 0x333   :  { %v604_v42 = vor.u32 1.1754944e-38, %v603_v37  ;;  %vm602_vm1 = vcmp.eq.f32.partialorder %v601_v39, 8.507059e+37 }
 0x337   :  { %v300_v12 = vpop.f32.mrf.mxu3 }
 0x3af   :  { %v331_v22 = vpop.f32.mrf.mxu0 }
 0x3b0   :  { %v336_v24 = vadd.f32 %v331_v22, %v931_v15 }
 0x3b7   :  { %v333_v23 = vpop.f32.mrf.mxu0 }
 0x3b8   :  { %v337_v25 = vadd.f32 %v333_v23, %v933_v16 }
 0x3ba   :  { %v338_v26 = vpack.c.bf16 %v337_v25, %v336_v24 }
 0x3bc   :  { %696 = vmatmul.msk.bf16.vlgmr.msra.gmra.mxu1 %vm102_vm3, %v338_v26 }
 0x439   :  { %v367_v15 = vpop.f32.mrf.mxu1 }
 0x43a   :  { %v372_v30 = vmax.f32 %v367_v15, 0.0 }
 0x441   :  { %v369_v16 = vpop.f32.mrf.mxu1 }
 0x442   :  { %v373_v31 = vmax.f32 %v369_v16, 0.0 }
 0x444   :  { %v374_v32 = vpack.c.bf16 %v373_v31, %v372_v30  ;;  %v589_v31 = vor.u32 1.1754944e-38, %v588_v27 }
 0x446   :  { %447 = vmatmul.bf16.vlgmr.msra.gmra.mxu2 %v374_v32 }
 0x4c9   :  { %v448_v56 = vpop.f32.mrf.mxu2 }
 0x4ca   :  { %v453_v58 = vadd.f32 %v448_v56, %v336_v24 }
 0x4d1   :  { %v450_v57 = vpop.f32.mrf.mxu2 }
 0x4d2   :  { %v454_v59 = vadd.f32 %v450_v57, %v337_v25 }
 0x4d4   :  { %v455_v60 = vpack.c.bf16 %v454_v59, %v453_v58 }
 0x4d6   :  { %737 = vmatmul.msk.bf16.vlgmr.msra.gmra.mxu3 %vm102_vm3, %v455_v60  ;;  %746 = vmatmul.msk.bf16.vlgmr.msrb.gmra.mxu0 %vm102_vm3, %v455_v60 }
 0x553   :  { %v526_v3 = vpop.f32.mrf.mxu0 }
 0x554   :  { %793 = vtanh.f32 %v526_v3 }
 0x559   :  { %v484_v62 = vpop.f32.mrf.mxu3 }
 0x55a   :  { %v499_v63 = vmul.f32 %v1013_v61, %v484_v62  ;;  %v794_v5 = vpop.eup %793 }
 0x55b   :  { %v528_v4 = vpop.f32.mrf.mxu0  ;;  %v533_v7 = vmul.f32 %v794_v5, %v1013_v61 }
 0x55c   :  { %613 = vrot.lane.b32.xlu2 %v499_v63, %s830_s1  ;;  %795 = vtanh.f32 %v528_v4 }
 0x55d   :  { %797 = vrcp.f32 %v570_v6  ;;  %v553_v8 = vsel %vm552_vm9, %v533_v7, 0.0 }
 0x55e   :  { %v554_v12 = vrot.slane %v553_v8, 4  ;;  %799 = vrcp.f32 %v575_v10 }
 0x560   :  { %v555_v17 = vadd.f32 %v554_v12, %v553_v8 }
 0x561   :  { %v486_v0 = vpop.f32.mrf.mxu3 }
 0x562   :  { %v500_v2 = vmul.f32 %v1016_v1, %v486_v0  ;;  %v796_v9 = vpop.eup %795  ;;  %v556_v21 = vrot.slane %v555_v17, 2 }
 0x563   :  { %v798_v11 = vpop.eup %797  ;;  %v534_v13 = vmul.f32 %v796_v9, %v1016_v1 }
 0x564   :  { %615 = vrot.lane.b32.xlu2 %v500_v2, %s830_s1  ;;  %v578_v14 = vmul.f32 %v798_v11, %v570_v6  ;;  %v800_v20 = vpop.eup %799  ;;  %vm583_vm11 = vweird.f32 %v798_v11  ;;  %v557_v25 = vadd.f32 %v556_v21, %v555_v17 }
 0x565   :  { %v560_v18 = vsel %vm552_vm9, %v534_v13, 0.0  ;;  %v593_v24 = vmul.f32 %v800_v20, %v575_v10  ;;  %vm584_vm12 = vmor %vm582_vm10, %vm583_vm11  ;;  %vm598_vm15 = vweird.f32 %v800_v20 }
 0x566   :  { %v579_v19 = vsub.f32 1.0, %v578_v14  ;;  %v561_v22 = vrot.slane %v560_v18, 4  ;;  %v558_v16 = vrot.slane %v557_v25, 1  ;;  %vm599_vm0 = vmor %vm597_vm14, %vm598_vm15 }
 0x567   :  { %v594_v15 = vsub.f32 1.0, %v593_v24 }
 0x568   :  { %v580_v23 = vmul.f32 %v798_v11, %v579_v19  ;;  %v562_v26 = vadd.f32 %v561_v22, %v560_v18  ;;  %v559_v34 = vadd.f32 %v558_v16, %v557_v25 }
 0x569   :  { %v595_v33 = vmul.f32 %v800_v20, %v594_v15 }
 0x56a   :  { %v581_v28 = vadd.f32 %v798_v11, %v580_v23  ;;  %v563_v30 = vrot.slane %v562_v26, 2 }
 0x56b   :  { %v596_v38 = vadd.f32 %v800_v20, %v595_v33 }
 0x56c   :  { %v585_v32 = vsel %vm584_vm12, %v798_v11, %v581_v28  ;;  %v564_v35 = vadd.f32 %v563_v30, %v562_v26 }
 0x56d   :  { %v590_v36 = vsel %vm587_vm13, %v589_v31, %v585_v32  ;;  %v600_v43 = vsel %vm599_vm0, %v800_v20, %v596_v38 }
 0x56e   :  { %v591_v40 = vmul.f32 %v590_v36, %v559_v34  ;;  %v565_v41 = vrot.slane %v564_v35, 1  ;;  %v605_v46 = vsel %vm602_vm1, %v604_v42, %v600_v43 }
 0x570   :  { %v607_v44 = vsub.f32 %v533_v7, %v591_v40  ;;  %v566_v45 = vadd.f32 %v565_v41, %v564_v35 }
 0x572   :  { %v609_v47 = vmul.f32 %v607_v44, %v1013_v61  ;;  %v606_v48 = vmul.f32 %v605_v46, %v566_v45 }
 0x574   :  { %v608_v51 = vsub.f32 %v534_v13, %v606_v48 }
 0x576   :  { %v610_v52 = vmul.f32 %v608_v51, %v1016_v1 }
 0x5b6   :  { %v614_v49 = vpop.permute.xlu2 %613 }
 0x5b7   :  { %v619_v50 = vsel %vm552_vm9, %v609_v47, %v614_v49 }
 0x5b8   :  { %621 = vst.msk [vmem:[#allocation2] sm:$0xff] %vm234_vm5, %v619_v50 }
 0x5be   :  { %v616_v53 = vpop.permute.xlu2 %615 }
 0x5bf   :  { %v620_v54 = vsel %vm552_vm9, %v610_v52, %v616_v53 }
 0x5c0   :  { %622 = vst.msk [vmem:[#allocation2 + $0x8] sm:$0xff] %vm234_vm5, %v620_v54 }
 0x5c1   :  { %635 = dma.vmem_to_hbm [thread:$0]  %s628_s12, 256, %s630_s14, [#allocation3], %s832_s3, %s832_s3, %s833_s15  }
 0x5c2   :  { %825 = dma.done.wait [#allocation3], 256  }
 0x5c3   :  { %826 = vsyncadd [#allocation3], 4294967040 }
 0x5c4   :  { %640 = vsyncpa [#allocation3], 1 }

</bundles_post_ra>
